<compile_context>
chip_gen: v6e
topology: v6e:2x2x1
jax: 0.10.0
libtpu: 0.0.40
codegen_flags: <defaults>
</compile_context>

<pallas_src>
import functools

import jax
import jax.numpy as jnp
import numpy as np
from jax.experimental import pallas as pl
from jax.experimental.pallas import tpu as pltpu


def _pwl_kernel(csum_ref, wsh_ref, x_ref, o_ref, *, n):
    """out = csum[min(trunc(n*x), n)] + frac(n*x) * w[min(trunc(n*x)+1, n)]

    wsh_ref[k] == w[min(k+1, n)], so a single mask (idx0 == k) drives both
    table selects.
    """
    x = x_ref[...].astype(jnp.float32)
    y = jnp.float32(n) * x
    idx = y.astype(jnp.int32)                 # trunc toward zero == torch .long()
    frac = y - idx.astype(jnp.float32)        # == torch.frac for these values
    idx0 = jnp.minimum(idx, n)                # .clamp(max=n)

    # Unrolled fused "gather" over the (n+1)-entry SMEM tables via VPU selects.
    acc0 = jnp.full_like(y, csum_ref[0])
    acc1 = jnp.full_like(y, wsh_ref[0])
    for k in range(1, n + 1):
        mask = idx0 == k
        acc0 = jnp.where(mask, csum_ref[k], acc0)
        acc1 = jnp.where(mask, wsh_ref[k], acc1)

    o_ref[...] = (acc0 + frac * acc1).astype(o_ref.dtype)


def piecewise_lin(x, weight, n, *, lanes=512, target_block_rows=512):
    """JAX/Pallas equivalent of PiecewiseLin.forward (element-wise on x).

    Precondition: x >= 0 (the module is applied to normalized maps in [0, 1)).
    """
    # --- small glue on the (n+1,) parameter vector (plain JAX) ---
    w = jnp.abs(weight)
    w = w / jnp.sum(w)
    csum = jnp.cumsum(w)
    # w_shift[k] = w[min(k+1, n)] -> lets the kernel use one mask per entry.
    w_shift = jnp.concatenate([w[1:], w[-1:]])

    # --- flatten x to a wide lane-dense 2-D slab ---
    orig_shape = x.shape
    total = x.size
    rows = -(-total // lanes)

    if rows <= target_block_rows:
        # Single block covering the whole slab (block == full array dims is
        # always a legal block shape; avoids row padding entirely).
        block_rows = rows
        rows_padded = rows
    else:
        block_rows = target_block_rows            # multiple of 8; 512x512 f32 = 1 MiB
        rows_padded = -(-rows // block_rows) * block_rows

    pad = rows_padded * lanes - total
    flat = x.reshape(-1)
    if pad > 0:
        flat = jnp.pad(flat, (0, pad))
    xf = flat.reshape(rows_padded, lanes)

    grid = (rows_padded // block_rows,)

    elem_bytes = jnp.dtype(x.dtype).itemsize
    cost = pl.CostEstimate(
        flops=(3 * (n + 1) + 8) * total,
        transcendentals=0,
        bytes_accessed=2 * elem_bytes * total,
    )

    out = pl.pallas_call(
        functools.partial(_pwl_kernel, n=n),
        out_shape=jax.ShapeDtypeStruct((rows_padded, lanes), x.dtype),
        grid_spec=pltpu.PrefetchScalarGridSpec(
            num_scalar_prefetch=2,                       # csum, w_shift -> SMEM
            grid=grid,
            in_specs=[
                pl.BlockSpec((block_rows, lanes), lambda i, csum, wsh: (i, 0)),
            ],
            out_specs=pl.BlockSpec((block_rows, lanes), lambda i, csum, wsh: (i, 0)),
        ),
        compiler_params=pltpu.CompilerParams(
            dimension_semantics=("parallel",)),
        cost_estimate=cost,
    )(csum, w_shift, xf)

    flat_out = out.reshape(-1)
    if pad > 0:
        flat_out = flat_out[:total]
    return flat_out.reshape(orig_shape)


def piecewise_lin_ref(x, weight, n):
    """Pure-JAX reference mirroring the PyTorch forward exactly."""
    w = jnp.abs(weight)
    w = w / jnp.sum(w)
    csum = jnp.cumsum(w)
    y = n * x
    idx = y.astype(jnp.int32)
    frac = y - idx.astype(x.dtype)
    i0 = jnp.minimum(idx, n)
    i1 = jnp.minimum(idx + 1, n)
    return csum[i0] + frac * w[i1]


if __name__ == "__main__":
    n = 16  # number of linear pieces

    # Deterministic parameter init matching PiecewiseLin.__init__:
    # weight = ones(n+1), weight[0] = 0 (plus a tiny deterministic perturbation
    # so the learned-table path is non-trivial).
    weight = jnp.ones((n + 1,), dtype=jnp.float32)
    weight = weight + 0.05 * jnp.arange(n + 1, dtype=jnp.float32)
    weight = weight.at[0].set(0.0)

    # Input: NCHW, values in [0, 1) (the module is used on normalized maps).
    key = jax.random.PRNGKey(0)
    x = jax.random.uniform(key, (2, 4, 16, 16), dtype=jnp.float32)

    out = piecewise_lin(x, weight, n)
    out = jax.block_until_ready(out)

    ref = piecewise_lin_ref(x, weight, n)
    np.testing.assert_allclose(np.asarray(out), np.asarray(ref),
                               rtol=1e-6, atol=1e-6)
    assert out.shape == x.shape and out.dtype == x.dtype

    print("KERNEL_OK")
</pallas_src>

<mosaic_0001>
module attributes {stable_mosaic.version = 11 : i64} {
  func.func @_pwl_kernel(%arg0: i32, %arg1: memref<17xf32, #tpu.memory_space<smem>>, %arg2: memref<17xf32, #tpu.memory_space<smem>>, %arg3: memref<4x512xf32, #tpu.memory_space<vmem>>, %arg4: memref<4x512xf32, #tpu.memory_space<vmem>>) attributes {dimension_semantics = [#tpu.dimension_semantics<parallel>], iteration_bounds = array<i64: 1>, scalar_prefetch = 2 : i64, scratch_operands = 0 : i64, tpu.core_type = #tpu.core_type<tc>, window_params = [{transform_indices = @transform_0, window_bounds = array<i64: 4, 512>}, {transform_indices = @transform_1, window_bounds = array<i64: 4, 512>}]} {
    %c0 = arith.constant 0 : index
    %c0_0 = arith.constant 0 : index
    %0 = vector.load %arg3[%c0, %c0_0] : memref<4x512xf32, #tpu.memory_space<vmem>>, vector<4x512xf32>
    %cst = arith.constant 1.600000e+01 : f32
    %1 = vector.broadcast %cst : f32 to vector<4x512xf32>
    %2 = arith.mulf %1, %0 : vector<4x512xf32>
    %3 = arith.fptosi %2 : vector<4x512xf32> to vector<4x512xi32>
    %4 = arith.sitofp %3 : vector<4x512xi32> to vector<4x512xf32>
    %5 = arith.subf %2, %4 : vector<4x512xf32>
    %c16_i32 = arith.constant 16 : i32
    %6 = vector.broadcast %c16_i32 : i32 to vector<4x512xi32>
    %7 = arith.minsi %3, %6 : vector<4x512xi32>
    %c0_1 = arith.constant 0 : index
    %8 = memref.load %arg1[%c0_1] : memref<17xf32, #tpu.memory_space<smem>>
    %9 = vector.broadcast %8 : f32 to vector<4x512xf32>
    %c0_2 = arith.constant 0 : index
    %10 = memref.load %arg2[%c0_2] : memref<17xf32, #tpu.memory_space<smem>>
    %11 = vector.broadcast %10 : f32 to vector<4x512xf32>
    %c1_i32 = arith.constant 1 : i32
    %12 = vector.broadcast %c1_i32 : i32 to vector<4x512xi32>
    %13 = arith.cmpi eq, %7, %12 : vector<4x512xi32>
    %c1 = arith.constant 1 : index
    %14 = memref.load %arg1[%c1] : memref<17xf32, #tpu.memory_space<smem>>
    %15 = vector.broadcast %14 : f32 to vector<4x512xf32>
    %16 = arith.select %13, %15, %9 : vector<4x512xi1>, vector<4x512xf32>
    %c1_3 = arith.constant 1 : index
    %17 = memref.load %arg2[%c1_3] : memref<17xf32, #tpu.memory_space<smem>>
    %18 = vector.broadcast %17 : f32 to vector<4x512xf32>
    %19 = arith.select %13, %18, %11 : vector<4x512xi1>, vector<4x512xf32>
    %c2_i32 = arith.constant 2 : i32
    %20 = vector.broadcast %c2_i32 : i32 to vector<4x512xi32>
    %21 = arith.cmpi eq, %7, %20 : vector<4x512xi32>
    %c2 = arith.constant 2 : index
    %22 = memref.load %arg1[%c2] : memref<17xf32, #tpu.memory_space<smem>>
    %23 = vector.broadcast %22 : f32 to vector<4x512xf32>
    %24 = arith.select %21, %23, %16 : vector<4x512xi1>, vector<4x512xf32>
    %c2_4 = arith.constant 2 : index
    %25 = memref.load %arg2[%c2_4] : memref<17xf32, #tpu.memory_space<smem>>
    %26 = vector.broadcast %25 : f32 to vector<4x512xf32>
    %27 = arith.select %21, %26, %19 : vector<4x512xi1>, vector<4x512xf32>
    %c3_i32 = arith.constant 3 : i32
    %28 = vector.broadcast %c3_i32 : i32 to vector<4x512xi32>
    %29 = arith.cmpi eq, %7, %28 : vector<4x512xi32>
    %c3 = arith.constant 3 : index
    %30 = memref.load %arg1[%c3] : memref<17xf32, #tpu.memory_space<smem>>
    %31 = vector.broadcast %30 : f32 to vector<4x512xf32>
    %32 = arith.select %29, %31, %24 : vector<4x512xi1>, vector<4x512xf32>
    %c3_5 = arith.constant 3 : index
    %33 = memref.load %arg2[%c3_5] : memref<17xf32, #tpu.memory_space<smem>>
    %34 = vector.broadcast %33 : f32 to vector<4x512xf32>
    %35 = arith.select %29, %34, %27 : vector<4x512xi1>, vector<4x512xf32>
    %c4_i32 = arith.constant 4 : i32
    %36 = vector.broadcast %c4_i32 : i32 to vector<4x512xi32>
    %37 = arith.cmpi eq, %7, %36 : vector<4x512xi32>
    %c4 = arith.constant 4 : index
    %38 = memref.load %arg1[%c4] : memref<17xf32, #tpu.memory_space<smem>>
    %39 = vector.broadcast %38 : f32 to vector<4x512xf32>
    %40 = arith.select %37, %39, %32 : vector<4x512xi1>, vector<4x512xf32>
    %c4_6 = arith.constant 4 : index
    %41 = memref.load %arg2[%c4_6] : memref<17xf32, #tpu.memory_space<smem>>
    %42 = vector.broadcast %41 : f32 to vector<4x512xf32>
    %43 = arith.select %37, %42, %35 : vector<4x512xi1>, vector<4x512xf32>
    %c5_i32 = arith.constant 5 : i32
    %44 = vector.broadcast %c5_i32 : i32 to vector<4x512xi32>
    %45 = arith.cmpi eq, %7, %44 : vector<4x512xi32>
    %c5 = arith.constant 5 : index
    %46 = memref.load %arg1[%c5] : memref<17xf32, #tpu.memory_space<smem>>
    %47 = vector.broadcast %46 : f32 to vector<4x512xf32>
    %48 = arith.select %45, %47, %40 : vector<4x512xi1>, vector<4x512xf32>
    %c5_7 = arith.constant 5 : index
    %49 = memref.load %arg2[%c5_7] : memref<17xf32, #tpu.memory_space<smem>>
    %50 = vector.broadcast %49 : f32 to vector<4x512xf32>
    %51 = arith.select %45, %50, %43 : vector<4x512xi1>, vector<4x512xf32>
    %c6_i32 = arith.constant 6 : i32
    %52 = vector.broadcast %c6_i32 : i32 to vector<4x512xi32>
    %53 = arith.cmpi eq, %7, %52 : vector<4x512xi32>
    %c6 = arith.constant 6 : index
    %54 = memref.load %arg1[%c6] : memref<17xf32, #tpu.memory_space<smem>>
    %55 = vector.broadcast %54 : f32 to vector<4x512xf32>
    %56 = arith.select %53, %55, %48 : vector<4x512xi1>, vector<4x512xf32>
    %c6_8 = arith.constant 6 : index
    %57 = memref.load %arg2[%c6_8] : memref<17xf32, #tpu.memory_space<smem>>
    %58 = vector.broadcast %57 : f32 to vector<4x512xf32>
    %59 = arith.select %53, %58, %51 : vector<4x512xi1>, vector<4x512xf32>
    %c7_i32 = arith.constant 7 : i32
    %60 = vector.broadcast %c7_i32 : i32 to vector<4x512xi32>
    %61 = arith.cmpi eq, %7, %60 : vector<4x512xi32>
    %c7 = arith.constant 7 : index
    %62 = memref.load %arg1[%c7] : memref<17xf32, #tpu.memory_space<smem>>
    %63 = vector.broadcast %62 : f32 to vector<4x512xf32>
    %64 = arith.select %61, %63, %56 : vector<4x512xi1>, vector<4x512xf32>
    %c7_9 = arith.constant 7 : index
    %65 = memref.load %arg2[%c7_9] : memref<17xf32, #tpu.memory_space<smem>>
    %66 = vector.broadcast %65 : f32 to vector<4x512xf32>
    %67 = arith.select %61, %66, %59 : vector<4x512xi1>, vector<4x512xf32>
    %c8_i32 = arith.constant 8 : i32
    %68 = vector.broadcast %c8_i32 : i32 to vector<4x512xi32>
    %69 = arith.cmpi eq, %7, %68 : vector<4x512xi32>
    %c8 = arith.constant 8 : index
    %70 = memref.load %arg1[%c8] : memref<17xf32, #tpu.memory_space<smem>>
    %71 = vector.broadcast %70 : f32 to vector<4x512xf32>
    %72 = arith.select %69, %71, %64 : vector<4x512xi1>, vector<4x512xf32>
    %c8_10 = arith.constant 8 : index
    %73 = memref.load %arg2[%c8_10] : memref<17xf32, #tpu.memory_space<smem>>
    %74 = vector.broadcast %73 : f32 to vector<4x512xf32>
    %75 = arith.select %69, %74, %67 : vector<4x512xi1>, vector<4x512xf32>
    %c9_i32 = arith.constant 9 : i32
    %76 = vector.broadcast %c9_i32 : i32 to vector<4x512xi32>
    %77 = arith.cmpi eq, %7, %76 : vector<4x512xi32>
    %c9 = arith.constant 9 : index
    %78 = memref.load %arg1[%c9] : memref<17xf32, #tpu.memory_space<smem>>
    %79 = vector.broadcast %78 : f32 to vector<4x512xf32>
    %80 = arith.select %77, %79, %72 : vector<4x512xi1>, vector<4x512xf32>
    %c9_11 = arith.constant 9 : index
    %81 = memref.load %arg2[%c9_11] : memref<17xf32, #tpu.memory_space<smem>>
    %82 = vector.broadcast %81 : f32 to vector<4x512xf32>
    %83 = arith.select %77, %82, %75 : vector<4x512xi1>, vector<4x512xf32>
    %c10_i32 = arith.constant 10 : i32
    %84 = vector.broadcast %c10_i32 : i32 to vector<4x512xi32>
    %85 = arith.cmpi eq, %7, %84 : vector<4x512xi32>
    %c10 = arith.constant 10 : index
    %86 = memref.load %arg1[%c10] : memref<17xf32, #tpu.memory_space<smem>>
    %87 = vector.broadcast %86 : f32 to vector<4x512xf32>
    %88 = arith.select %85, %87, %80 : vector<4x512xi1>, vector<4x512xf32>
    %c10_12 = arith.constant 10 : index
    %89 = memref.load %arg2[%c10_12] : memref<17xf32, #tpu.memory_space<smem>>
    %90 = vector.broadcast %89 : f32 to vector<4x512xf32>
    %91 = arith.select %85, %90, %83 : vector<4x512xi1>, vector<4x512xf32>
    %c11_i32 = arith.constant 11 : i32
    %92 = vector.broadcast %c11_i32 : i32 to vector<4x512xi32>
    %93 = arith.cmpi eq, %7, %92 : vector<4x512xi32>
    %c11 = arith.constant 11 : index
    %94 = memref.load %arg1[%c11] : memref<17xf32, #tpu.memory_space<smem>>
    %95 = vector.broadcast %94 : f32 to vector<4x512xf32>
    %96 = arith.select %93, %95, %88 : vector<4x512xi1>, vector<4x512xf32>
    %c11_13 = arith.constant 11 : index
    %97 = memref.load %arg2[%c11_13] : memref<17xf32, #tpu.memory_space<smem>>
    %98 = vector.broadcast %97 : f32 to vector<4x512xf32>
    %99 = arith.select %93, %98, %91 : vector<4x512xi1>, vector<4x512xf32>
    %c12_i32 = arith.constant 12 : i32
    %100 = vector.broadcast %c12_i32 : i32 to vector<4x512xi32>
    %101 = arith.cmpi eq, %7, %100 : vector<4x512xi32>
    %c12 = arith.constant 12 : index
    %102 = memref.load %arg1[%c12] : memref<17xf32, #tpu.memory_space<smem>>
    %103 = vector.broadcast %102 : f32 to vector<4x512xf32>
    %104 = arith.select %101, %103, %96 : vector<4x512xi1>, vector<4x512xf32>
    %c12_14 = arith.constant 12 : index
    %105 = memref.load %arg2[%c12_14] : memref<17xf32, #tpu.memory_space<smem>>
    %106 = vector.broadcast %105 : f32 to vector<4x512xf32>
    %107 = arith.select %101, %106, %99 : vector<4x512xi1>, vector<4x512xf32>
    %c13_i32 = arith.constant 13 : i32
    %108 = vector.broadcast %c13_i32 : i32 to vector<4x512xi32>
    %109 = arith.cmpi eq, %7, %108 : vector<4x512xi32>
    %c13 = arith.constant 13 : index
    %110 = memref.load %arg1[%c13] : memref<17xf32, #tpu.memory_space<smem>>
    %111 = vector.broadcast %110 : f32 to vector<4x512xf32>
    %112 = arith.select %109, %111, %104 : vector<4x512xi1>, vector<4x512xf32>
    %c13_15 = arith.constant 13 : index
    %113 = memref.load %arg2[%c13_15] : memref<17xf32, #tpu.memory_space<smem>>
    %114 = vector.broadcast %113 : f32 to vector<4x512xf32>
    %115 = arith.select %109, %114, %107 : vector<4x512xi1>, vector<4x512xf32>
    %c14_i32 = arith.constant 14 : i32
    %116 = vector.broadcast %c14_i32 : i32 to vector<4x512xi32>
    %117 = arith.cmpi eq, %7, %116 : vector<4x512xi32>
    %c14 = arith.constant 14 : index
    %118 = memref.load %arg1[%c14] : memref<17xf32, #tpu.memory_space<smem>>
    %119 = vector.broadcast %118 : f32 to vector<4x512xf32>
    %120 = arith.select %117, %119, %112 : vector<4x512xi1>, vector<4x512xf32>
    %c14_16 = arith.constant 14 : index
    %121 = memref.load %arg2[%c14_16] : memref<17xf32, #tpu.memory_space<smem>>
    %122 = vector.broadcast %121 : f32 to vector<4x512xf32>
    %123 = arith.select %117, %122, %115 : vector<4x512xi1>, vector<4x512xf32>
    %c15_i32 = arith.constant 15 : i32
    %124 = vector.broadcast %c15_i32 : i32 to vector<4x512xi32>
    %125 = arith.cmpi eq, %7, %124 : vector<4x512xi32>
    %c15 = arith.constant 15 : index
    %126 = memref.load %arg1[%c15] : memref<17xf32, #tpu.memory_space<smem>>
    %127 = vector.broadcast %126 : f32 to vector<4x512xf32>
    %128 = arith.select %125, %127, %120 : vector<4x512xi1>, vector<4x512xf32>
    %c15_17 = arith.constant 15 : index
    %129 = memref.load %arg2[%c15_17] : memref<17xf32, #tpu.memory_space<smem>>
    %130 = vector.broadcast %129 : f32 to vector<4x512xf32>
    %131 = arith.select %125, %130, %123 : vector<4x512xi1>, vector<4x512xf32>
    %c16_i32_18 = arith.constant 16 : i32
    %132 = vector.broadcast %c16_i32_18 : i32 to vector<4x512xi32>
    %133 = arith.cmpi eq, %7, %132 : vector<4x512xi32>
    %c16 = arith.constant 16 : index
    %134 = memref.load %arg1[%c16] : memref<17xf32, #tpu.memory_space<smem>>
    %135 = vector.broadcast %134 : f32 to vector<4x512xf32>
    %136 = arith.select %133, %135, %128 : vector<4x512xi1>, vector<4x512xf32>
    %c16_19 = arith.constant 16 : index
    %137 = memref.load %arg2[%c16_19] : memref<17xf32, #tpu.memory_space<smem>>
    %138 = vector.broadcast %137 : f32 to vector<4x512xf32>
    %139 = arith.select %133, %138, %131 : vector<4x512xi1>, vector<4x512xf32>
    %140 = arith.mulf %5, %139 : vector<4x512xf32>
    %141 = arith.addf %136, %140 : vector<4x512xf32>
    %c0_20 = arith.constant 0 : index
    %c0_21 = arith.constant 0 : index
    %142 = vector.load %arg4[%c0_20, %c0_21] : memref<4x512xf32, #tpu.memory_space<vmem>>, vector<4x512xf32>
    tpu.vector_store %arg4[%c0_20, %c0_21], %141 {strides = array<i32>} : memref<4x512xf32, #tpu.memory_space<vmem>>, vector<4x512xf32>,
    return
  }
  func.func @transform_0(%arg0: i32, %arg1: memref<17xf32, #tpu.memory_space<smem>>, %arg2: memref<17xf32, #tpu.memory_space<smem>>) -> (i32, i32) {
    %c0_i32 = arith.constant 0 : i32
    %c0_i32_0 = arith.constant 0 : i32
    return %arg0, %c0_i32 : i32, i32
  }
  func.func @transform_1(%arg0: i32, %arg1: memref<17xf32, #tpu.memory_space<smem>>, %arg2: memref<17xf32, #tpu.memory_space<smem>>) -> (i32, i32) {
    %c0_i32 = arith.constant 0 : i32
    %c0_i32_0 = arith.constant 0 : i32
    return %arg0, %c0_i32 : i32, i32
  }
}

</mosaic_0001>

<bundles_post_ra>
// kernel: tpu_custom_call.1
= control target key start
LH: loop header
LB: loop body
LE: loop exit
PB: predicated region body
PF: predicated region fallthrough
CT: control target
= control target key end

     0   :  { %s336_s12 = smov [#allocation3]   ;;  %s659_s0 = inlined_call_operand.hbm [shape: f32[17], index: 0, kind: input, shape index: {}]   ;;  %s660_s2 = inlined_call_operand.hbm [shape: f32[4,512], index: 2, kind: input, shape index: {}]   ;;  %s661_s3 = inlined_call_operand.hbm [shape: f32[4,512], index: 3, kind: output, shape index: {}]   ;;  %s662_s1 = inlined_call_operand.vmem [shape: f32[17], index: 1, kind: input, shape index: {}]  }
   0x1   :  { %663 = sst [smem:[#allocation12_spill]] %s661_s3  ;;  %s10_s17 = sshll.u32 %s662_s1, 4  ;;  %s11_s17 = int_to_ptr.vmem [resolvable:$true] %s10_s17 }
   0x2   :  { %9 = dma.hbm_to_smem %s659_s0, 16, %s336_s12, [#allocation2] }
   0x3   :  { %s278_s18 = scalar_lea.vmem %s11_s17, 16  ;;  %p283_p1 = scmp.lt.s32.totalorder %s11_s17, %s11_s17 }
   0x4   :  { %p279_p0 = scmp.ne.s32.totalorder %s11_s17, %s278_s18  ;;  %p284_p2 = scmp.lt.s32.totalorder %s278_s18, %s278_s18 }
   0x6   :  { %p285_p3 = por %p284_p2, %p283_p1 }
   0x8   :  { %p286_p4 = pnand %p285_p3, %p279_p0 }
   0xa   :  { %289 = shalt.err (!%p286_p4)  }
   0xb   :  { %s337_s19 = smov [#allocation4]  }
   0xc   :  { %13 = dma.vmem_to_smem %s11_s17, 16, %s337_s19, [#allocation2] }
   0xd   :  { %330 = dma.done.wait [#allocation2], 32 }
   0xe   :  { %331 = vsyncadd [#allocation2], 4294967264 }
   0xf   :  { %15 = sfence }
  0x10   :  { %16 = vsyncpa [#allocation6], 0 }
  0x11   :  { %17 = vsyncpa [#allocation7], 0  ;;  %s338_s0 = smov [#allocation5]  }
  0x12   :  { %s24_s20 = sshll.u32 %s338_s0, 4  ;;  %s25_s20 = int_to_ptr.vmem [resolvable:$true] %s24_s20 }
  0x13   :  { %s298_s21 = scalar_lea.vmem %s25_s20, 256  ;;  %p303_p6 = scmp.lt.s32.totalorder %s25_s20, %s25_s20 }
  0x14   :  { %p299_p5 = scmp.ne.s32.totalorder %s25_s20, %s298_s21  ;;  %p304_p7 = scmp.lt.s32.totalorder %s298_s21, %s298_s21 }
  0x16   :  { %p305_p8 = por %p304_p7, %p303_p6 }
  0x18   :  { %p306_p9 = pnand %p305_p8, %p299_p5 }
  0x1a   :  { %309 = shalt.err (!%p306_p9)
}
  0x1b   :  { %27 = dma.hbm_to_vmem [thread:$0]  %s660_s2, 256, %s25_s20, [#allocation6]  }
  0x1c   :  { %332 = dma.done.wait [#allocation6], 256  }
  0x1d   :  { %333 = vsyncadd [#allocation6], 4294967040  ;;  %s369_s23 = sld [smem:[#allocation3]]  ;;  %v31_v0 = vld [vmem:[#allocation5] sm:$0xff]  ;;  %v32_v1 = vld [vmem:[#allocation5 + $0x8] sm:$0xff] }
  0x1e   :  { %s371_s24 = sld [smem:[#allocation4]]  ;;  %v383_v2 = vmul.f32 16.0, %v31_v0  ;;  %v387_v3 = vmul.f32 16.0, %v32_v1 }
  0x1f   :  { %s373_s25 = sld [smem:[#allocation3 + $0x1]] }
  0x20   :  { %s375_s26 = sld [smem:[#allocation4 + $0x1]]  ;;  %v262_v4 = vtrunc.f32 %v383_v2  ;;  %v264_v5 = vtrunc.f32 %v387_v3 }
  0x21   :  { %s377_s27 = sld [smem:[#allocation3 + $0x2]] }
  0x22   :  { %s379_s28 = sld [smem:[#allocation4 + $0x2]]  ;;  %v397_v6 = vcvt.f32.s32 %v262_v4  ;;  %v412_v13 = vcvt.f32.s32 %v264_v5 }
  0x23   :  { %s381_s2 = sld [smem:[#allocation3 + $0x3]]  ;;  %v46_v7 = vstv %s369_s23 }
  0x24   :  { %s385_s29 = sld [smem:[#allocation4 + $0x3]]  ;;  %v48_v8 = vstv %s371_s24  ;;  %vm41_vm0 = vcmp.lt.s32.totalorder %v397_v6, 16  ;;  %v37_v14 = vcvt.s32.f32 %v397_v6  ;;  %v38_v41 = vcvt.s32.f32 %v412_v13 }
  0x25   :  { %s389_s30 = sld [smem:[#allocation3 + $0x4]]  ;;  %v52_v9 = vstv %s373_s25  ;;  %v416_v15 = vsel %vm41_vm0, %v397_v6, 16  ;;  %vm43_vm10 = vcmp.lt.s32.totalorder %v412_v13, 16 }
  0x26   :  { %s392_s4 = sld [smem:[#allocation4 + $0x4]]  ;;  %v56_v10 = vstv %s375_s26  ;;  %vm49_vm1 = vcmp.eq.s32.totalorder %v416_v15, 1  ;;  %vm59_vm2 = vcmp.eq.s32.totalorder %v416_v15, 2  ;;  %vm69_vm3 = vcmp.eq.s32.totalorder %v416_v15, 3 }
  0x27   :  { %s395_s5 = sld [smem:[#allocation3 + $0x5]]  ;;  %v62_v11 = vstv %s377_s27  ;;  %v53_v19 = vsel %vm49_vm1, %v52_v9, %v46_v7  ;;  %v57_v20 = vsel %vm49_vm1, %v56_v10, %v48_v8  ;;  %vm79_vm4 = vcmp.eq.s32.totalorder %v416_v15, 4 }
  0x28   :  { %s399_s6 = sld [smem:[#allocation4 + $0x5]]  ;;  %v66_v12 = vstv %s379_s28  ;;  %v63_v22 = vsel %vm59_vm2, %v62_v11, %v53_v19  ;;  %vm89_vm5 = vcmp.eq.s32.totalorder %v416_v15, 5  ;;  %vm99_vm6 = vcmp.eq.s32.totalorder %v416_v15, 6 }
  0x29   :  { %s405_s7 = sld [smem:[#allocation3 + $0x6]]  ;;  %v72_v16 = vstv %s381_s2  ;;  %v67_v23 = vsel %vm59_vm2, %v66_v12, %v57_v20  ;;  %vm109_vm7 = vcmp.eq.s32.totalorder %v416_v15, 7  ;;  %vm119_vm8 = vcmp.eq.s32.totalorder %v416_v15, 8 }
  0x2a   :  { %s410_s8 = sld [smem:[#allocation4 + $0x6]]  ;;  %v76_v17 = vstv %s385_s29  ;;  %v73_v25 = vsel %vm69_vm3, %v72_v16, %v63_v22  ;;  %vm129_vm9 = vcmp.eq.s32.totalorder %v416_v15, 9  ;;  %v496_v44 = vsub.f32 %v383_v2, %v37_v14 }
  0x2b   :  { %s420_s9 = sld [smem:[#allocation3 + $0x7]]  ;;  %v82_v18 = vstv %s389_s30  ;;  %v77_v26 = vsel %vm69_vm3, %v76_v17, %v67_v23  ;;  %vm139_vm11 = vcmp.eq.s32.totalorder %v416_v15, 10  ;;  %vm149_vm12 = vcmp.eq.s32.totalorder %v416_v15, 11 }
  0x2c   :  { %s426_s10 = sld [smem:[#allocation4 + $0x7]]  ;;  %v86_v21 = vstv %s392_s4  ;;  %v83_v28 = vsel %vm79_vm4, %v82_v18, %v73_v25  ;;  %vm159_vm13 = vcmp.eq.s32.totalorder %v416_v15, 12  ;;  %vm169_vm14 = vcmp.eq.s32.totalorder %v416_v15, 13 }
  0x2d   :  { %s438_s11 = sld [smem:[#allocation3 + $0x8]]  ;;  %v92_v24 = vstv %s395_s5  ;;  %v87_v29 = vsel %vm79_vm4, %v86_v21, %v77_v26  ;;  %vm179_vm15 = vcmp.eq.s32.totalorder %v416_v15, 14  ;;  %vm189_vm0 = vcmp.eq.s32.totalorder %v416_v15, 15 }
  0x2e   :  { %s446_s12 = sld [smem:[#allocation4 + $0x8]]  ;;  %v96_v27 = vstv %s399_s6  ;;  %v93_v32 = vsel %vm89_vm5, %v92_v24, %v83_v28  ;;  %v529_v53 = vsel %vm43_vm10, %v412_v13, 16  ;;  %vm199_vm3 = vcmp.eq.s32.totalorder %v416_v15, 16 }
  0x2f   :  { %s454_s13 = sld [smem:[#allocation3 + $0x9]]  ;;  %v102_v30 = vstv %s405_s7  ;;  %v97_v33 = vsel %vm89_vm5, %v96_v27, %v87_v29  ;;  %vm50_vm1 = vcmp.eq.s32.totalorder %v529_v53, 1  ;;  %vm60_vm2 = vcmp.eq.s32.totalorder %v529_v53, 2 }
  0x30   :  { %v106_v31 = vstv %s410_s8  ;;  %s462_s14 = sld [smem:[#allocation4 + $0x9]]  ;;  %v103_v35 = vsel %vm99_vm6, %v102_v30, %v93_v32  ;;  %v54_v58 = vsel %vm50_vm1, %v52_v9, %v46_v7  ;;  %v58_v59 = vsel %vm50_vm1, %v56_v10, %v48_v8 }
  0x31   :  { %v112_v34 = vstv %s420_s9  ;;  %s470_s15 = sld [smem:[#allocation3 + $0xa]]  ;;  %v107_v36 = vsel %vm99_vm6, %v106_v31, %v97_v33  ;;  %v64_v62 = vsel %vm60_vm2, %v62_v11, %v54_v58  ;;  %v68_v63 = vsel %vm60_vm2, %v66_v12, %v58_v59 }
  0x32   :  { %v116_v37 = vstv %s426_s10  ;;  %s478_s16 = sld [smem:[#allocation4 + $0xa]]  ;;  %v113_v38 = vsel %vm109_vm7, %v112_v34, %v103_v35  ;;  %vm70_vm4 = vcmp.eq.s32.totalorder %v529_v53, 3  ;;  %vm80_vm5 = vcmp.eq.s32.totalorder %v529_v53, 4 }
  0x33   :  { %v117_v39 = vsel %vm109_vm7, %v116_v37, %v107_v36  ;;  %v122_v40 = vstv %s438_s11  ;;  %s485_s17 = sld [smem:[#allocation3 + $0xb]]  ;;  %v74_v5 = vsel %vm70_vm4, %v72_v16, %v64_v62  ;;  %v78_v6 = vsel %vm70_vm4, %v76_v17, %v68_v63 }
  0x34   :  { %v123_v42 = vsel %vm119_vm8, %v122_v40, %v113_v38  ;;  %v126_v43 = vstv %s446_s12  ;;  %s492_s18 = sld [smem:[#allocation4 + $0xb]]  ;;  %v84_v9 = vsel %vm80_vm5, %v82_v18, %v74_v5  ;;  %v88_v10 = vsel %vm80_vm5, %v86_v21, %v78_v6 }
  0x35   :  { %v127_v45 = vsel %vm119_vm8, %v126_v43, %v117_v39  ;;  %v132_v46 = vstv %s454_s13  ;;  %s502_s19 = sld [smem:[#allocation3 + $0xc]]  ;;  %vm90_vm6 = vcmp.eq.s32.totalorder %v529_v53, 5  ;;  %vm100_vm7 = vcmp.eq.s32.totalorder %v529_v53, 6 }
  0x36   :  { %v133_v47 = vsel %vm129_vm9, %v132_v46, %v123_v42  ;;  %v136_v48 = vstv %s462_s14  ;;  %s509_s0 = sld [smem:[#allocation4 + $0xc]]  ;;  %v94_v17 = vsel %vm90_vm6, %v92_v24, %v84_v9  ;;  %v98_v18 = vsel %vm90_vm6, %v96_v27, %v88_v10 }
  0x37   :  { %v137_v49 = vsel %vm129_vm9, %v136_v48, %v127_v45  ;;  %v142_v50 = vstv %s470_s15  ;;  %s515_s20 = sld [smem:[#allocation3 + $0xd]]  ;;  %v104_v21 = vsel %vm100_vm7, %v102_v30, %v94_v17  ;;  %v108_v22 = vsel %vm100_vm7, %v106_v31, %v98_v18 }
  0x38   :  { %v143_v51 = vsel %vm139_vm11, %v142_v50, %v133_v47  ;;  %v146_v52 = vstv %s478_s16  ;;  %s523_s21 = sld [smem:[#allocation4 + $0xd]]  ;;  %vm110_vm8 = vcmp.eq.s32.totalorder %v529_v53, 7  ;;  %vm120_vm9 = vcmp.eq.s32.totalorder %v529_v53, 8 }
  0x39   :  { %v147_v54 = vsel %vm139_vm11, %v146_v52, %v137_v49  ;;  %v152_v55 = vstv %s485_s17  ;;  %s536_s1 = sld [smem:[#allocation3 + $0xe]]  ;;  %v114_v27 = vsel %vm110_vm8, %v112_v34, %v104_v21  ;;  %v118_v28 = vsel %vm110_vm8, %v116_v37, %v108_v22 }
  0x3a   :  { %v153_v56 = vsel %vm149_vm12, %v152_v55, %v143_v51  ;;  %v156_v57 = vstv %s492_s18  ;;  %s545_s22 = sld [smem:[#allocation4 + $0xe]]  ;;  %v124_v31 = vsel %vm120_vm9, %v122_v40, %v114_v27  ;;  %v128_v32 = vsel %vm120_vm9, %v126_v43, %v118_v28 }
  0x3b   :  { %v157_v60 = vsel %vm149_vm12, %v156_v57, %v147_v54  ;;  %v162_v61 = vstv %s502_s19  ;;  %s561_s3 = sld [smem:[#allocation3 + $0xf]]  ;;  %vm130_vm10 = vcmp.eq.s32.totalorder %v529_v53, 9  ;;  %vm140_vm11 = vcmp.eq.s32.totalorder %v529_v53, 10 }
  0x3c   :  { %v163_v0 = vsel %vm159_vm13, %v162_v61, %v153_v56  ;;  %v166_v1 = vstv %s509_s0  ;;  %s570_s23 = sld [smem:[#allocation4 + $0xf]]  ;;  %vm150_vm12 = vcmp.eq.s32.totalorder %v529_v53, 11  ;;  %v134_v35 = vsel %vm130_vm10, %v132_v46, %v124_v31 }
  0x3d   :  { %v167_v2 = vsel %vm159_vm13, %v166_v1, %v157_v60  ;;  %v172_v4 = vstv %s515_s20  ;;  %s577_s24 = sld [smem:[#allocation3 + $0x10]]  ;;  %v138_v36 = vsel %vm130_vm10, %v136_v48, %v128_v32  ;;  %vm160_vm13 = vcmp.eq.s32.totalorder %v529_v53, 12 }
  0x3e   :  { %v173_v7 = vsel %vm169_vm14, %v172_v4, %v163_v0  ;;  %v176_v8 = vstv %s523_s21  ;;  %s586_s25 = sld [smem:[#allocation4 + $0x10]]  ;;  %v144_v37 = vsel %vm140_vm11, %v142_v50, %v134_v35  ;;  %v148_v38 = vsel %vm140_vm11, %v146_v52, %v138_v36 }
  0x3f   :  { %v177_v11 = vsel %vm169_vm14, %v176_v8, %v167_v2  ;;  %v182_v12 = vstv %s536_s1  ;;  %vm170_vm14 = vcmp.eq.s32.totalorder %v529_v53, 13  ;;  %v154_v39 = vsel %vm150_vm12, %v152_v55, %v144_v37 }
  0x40   :  { %v183_v14 = vsel %vm179_vm15, %v182_v12, %v173_v7  ;;  %v186_v16 = vstv %s545_s22  ;;  %v158_v40 = vsel %vm150_vm12, %v156_v57, %v148_v38  ;;  %v164_v42 = vsel %vm160_vm13, %v162_v61, %v154_v39 }
  0x41   :  { %v187_v19 = vsel %vm179_vm15, %v186_v16, %v177_v11  ;;  %v192_v20 = vstv %s561_s3  ;;  %vm180_vm15 = vcmp.eq.s32.totalorder %v529_v53, 14  ;;  %v168_v43 = vsel %vm160_vm13, %v166_v1, %v158_v40  ;;  %s339_s3 = smov [#allocation8]  }
  0x42   :  { %v193_v23 = vsel %vm189_vm0, %v192_v20, %v183_v14  ;;  %v196_v25 = vstv %s570_s23  ;;  %v174_v45 = vsel %vm170_vm14, %v172_v4, %v164_v42  ;;  %v178_v46 = vsel %vm170_vm14, %v176_v8, %v168_v43  ;;  %s221_s26 = sshll.u32 %s339_s3, 4  ;;  %s222_s26 = int_to_ptr.vmem [resolvable:$true] %s221_s26 }
  0x43   :  { %v197_v24 = vsel %vm189_vm0, %v196_v25, %v187_v19  ;;  %v202_v26 = vstv %s577_s24  ;;  %vm190_vm0 = vcmp.eq.s32.totalorder %v529_v53, 15  ;;  %vm200_vm1 = vcmp.eq.s32.totalorder %v529_v53, 16  ;;  %s310_s27 = scalar_lea.vmem %s222_s26, 256  ;;  %p315_p11 = scmp.lt.s32.totalorder %s222_s26, %s222_s26 }
  0x44   :  { %v203_v29 = vsel %vm199_vm3, %v202_v26, %v193_v23  ;;  %v206_v30 = vstv %s586_s25  ;;  %v184_v47 = vsel %vm180_vm15, %v182_v12, %v174_v45  ;;  %v188_v48 = vsel %vm180_vm15, %v186_v16, %v178_v46  ;;  %p311_p10 = scmp.ne.s32.totalorder %s222_s26, %s310_s27  ;;  %p316_p12 = scmp.lt.s32.totalorder %s310_s27, %s310_s27 }
  0x45   :  { %v207_v33 = vsel %vm199_vm3, %v206_v30, %v197_v24  ;;  %v194_v49 = vsel %vm190_vm0, %v192_v20, %v184_v47  ;;  %v198_v50 = vsel %vm190_vm0, %v196_v25, %v188_v48 }
  0x46   :  { %v209_v34 = vmul.f32 %v207_v33, %v496_v44  ;;  %v40_v44 = vsub.f32 %v387_v3, %v38_v41  ;;  %v204_v51 = vsel %vm200_vm1, %v202_v26, %v194_v49  ;;  %v208_v52 = vsel %vm200_vm1, %v206_v30, %v198_v50  ;;  %p317_p13 = por %p316_p12, %p315_p11 }
  0x48   :  { %v211_v15 = vadd.f32 %v209_v34, %v203_v29  ;;  %v210_v54 = vmul.f32 %v208_v52, %v40_v44  ;;  %p318_p0 = pnand %p317_p13, %p311_p10 }
  0x4a   :  { %213 = vst [vmem:[#allocation8] sm:$0xff] %v211_v15  ;;  %v212_v55 = vadd.f32 %v210_v54, %v204_v51 }
  0x4c   :  { %214 = vst [vmem:[#allocation8 + $0x8] sm:$0xff] %v212_v55 }
  0x4d   :  { %321 = shalt.err (!%p318_p0)
}
  0x4e   :  { %s664_s29 = sld [smem:[#allocation12_spill]] }
  0x54   :  { %224 = dma.vmem_to_hbm [thread:$0]  %s222_s26, 256, %s664_s29, [#allocation7]  }
  0x55   :  { %334 = dma.done.wait [#allocation7], 256  }
  0x56   :  { %335 = vsyncadd [#allocation7], 4294967040 }
  0x57   :  { %228 = vsyncpa [#allocation6], 1 }
  0x58   :  { %229 = vsyncpa [#allocation7], 1 }

</bundles_post_ra>
